<compile_context>
chip_gen: v7x
topology: tpu7x:2x2x1
jax: 0.10.0
libtpu: 0.0.40
codegen_flags: <defaults>
</compile_context>

<pallas_src>
import functools

import jax
import jax.numpy as jnp
from jax.experimental import pallas as pl
from jax.experimental.pallas import tpu as pltpu

# MXU feed dtype for the conv contractions.  bf16 operands run at full MXU
# rate on every TPU generation and halve the tap footprint; accumulation stays
# in f32 (preferred_element_type) and the ReLU/BatchNorm math is f32.
_MATMUL_DTYPE = jnp.bfloat16

_BN_EPS = 1e-5


def _conv_relu_bn(h, w, b, gamma, beta, tap_masks, valid_mask, *,
                  pad, total_lanes, valid_count):
    """One fused Conv1d('same') -> ReLU -> BatchNorm1d(training) layer.

    h            : (C, N*Lp) f32 activations, batch folded into the lane axis.
    w            : (K, Cout, Cin) tap-major weights in _MATMUL_DTYPE.
    b/gamma/beta : (C, 1) f32 per-channel columns.
    tap_masks    : K masks of shape (1, N*Lp) (None for the centre tap).
    valid_mask   : (1, N*Lp) mask of non-pad lanes (None if L == Lp).
    """
    K = w.shape[0]
    P = pad
    Ltot = total_lanes

    # ---- per-tap accumulation: acc += W_k @ masked_roll_k(h) (no im2col) ----
    # Rolls ride the XLU (otherwise-idle slot); each tap is one small MXU push.
    # Note: at C=8 the matmul uses only a sliver of the MXU -- the kernel is
    # HBM/VPU-bound, so IO layout (not MXU shape) is the optimization target.
    acc = None
    for k in range(K):
        shift = (P - k) % Ltot                       # non-negative lane rotation
        tap = h if shift == 0 else pltpu.roll(h, shift=shift, axis=1)
        if tap_masks[k] is not None:                 # zero 'same'-padding reads
            tap = jnp.where(tap_masks[k], tap, 0.0)  # (also kills batch wrap)
        contrib = jnp.dot(w[k], tap.astype(w.dtype),
                          preferred_element_type=jnp.float32)
        acc = contrib if acc is None else acc + contrib

    y = acc + b                                      # (C, N*Lp)
    if valid_mask is not None:
        # Must precede the BN sums: the bias makes pad lanes nonzero.
        y = jnp.where(valid_mask, y, 0.0)

    # ---- ReLU ----
    y = jnp.maximum(y, 0.0)

    # ---- training-mode BatchNorm1d, centered (two-pass) biased variance ----
    inv_n = 1.0 / float(valid_count)
    mean = jnp.sum(y, axis=-1, keepdims=True) * inv_n            # (C, 1)
    diff = y - mean
    if valid_mask is not None:
        diff = jnp.where(valid_mask, diff, 0.0)                  # pads -> 0
    var = jnp.sum(diff * diff, axis=-1, keepdims=True) * inv_n   # biased var
    scale = gamma * jax.lax.rsqrt(var + _BN_EPS)                 # (C, 1)
    # TODO(synk): nonzero Dropout2d would mask whole channels here via
    # pltpu.prng_seed / prng_random_bits; the module default p=0.0 is identity.
    return diff * scale + beta


def residual_cnn_kernel(x_ref,
                        w1_ref, b1_ref, g1_ref, be1_ref,
                        w2_ref, b2_ref, g2_ref, be2_ref,
                        o_ref, fold_ref, *,
                        kernel_size, length, padded_length, valid_count):
    K = kernel_size
    P = K // 2
    L = length
    Lp = padded_length
    N, C, _ = x_ref.shape
    Ltot = N * Lp
    zero_pad = Lp != L

    # ---- fold batch into lanes inside VMEM (no HBM transpose round trip) ----
    for n in range(N):
        fold_ref[:, n * Lp:(n + 1) * Lp] = x_ref[n].astype(jnp.float32)
    x = fold_ref[...]                                            # (C, N*Lp)

    # ---- boundary / pad masks: built once, shared by both layers ----
    lane = jax.lax.broadcasted_iota(jnp.int32, (1, Ltot), 1) % Lp  # in-batch pos
    valid_mask = (lane < L) if zero_pad else None
    tap_masks = []
    for k in range(K):
        if k == P:
            tap_masks.append(None)       # centre tap: source == dest, valid
        else:
            # source valid iff 0 <= l + (k - P) < L; the same test also masks
            # any cross-batch wrap introduced by the circular roll.
            tap_masks.append(jnp.logical_and(lane >= P - k, lane < L + P - k))

    h = _conv_relu_bn(x, w1_ref[...], b1_ref[...], g1_ref[...], be1_ref[...],
                      tap_masks, valid_mask, pad=P, total_lanes=Ltot,
                      valid_count=valid_count)
    h = _conv_relu_bn(h, w2_ref[...], b2_ref[...], g2_ref[...], be2_ref[...],
                      tap_masks, valid_mask, pad=P, total_lanes=Ltot,
                      valid_count=valid_count)

    # ---- residual add, unfold back to (N, C, Lp); Lp is a 128 multiple so
    # every store is an unmasked full-lane store ----
    res = h + x
    for n in range(N):
        o_ref[n] = res[:, n * Lp:(n + 1) * Lp].astype(o_ref.dtype)


def _vmem_capacity_bytes():
    """Physical VMEM per TensorCore (64 MiB on v7x, 128 MiB on v5e/v6e)."""
    try:
        cap = getattr(pltpu.get_tpu_info(), "vmem_capacity_bytes", None)
        if cap:
            return int(cap)
    except Exception:
        pass
    return 64 << 20  # conservative (v7x-sized) fallback


def residual_cnn(x, params, kernel_size):
    """x: (N, C, L) in the PyTorch Conv1d layout."""
    N, C, L = x.shape
    K = kernel_size
    assert K % 2 == 1, "kernel size must be odd for a shape-preserving residual"

    # Lane-dense length: pad L up to a multiple of 128 (no-op when aligned).
    # No batch/channel transposes happen in HBM -- folding is done in-kernel.
    Lp = ((L + 127) // 128) * 128
    Ltot = N * Lp
    xp = x.astype(jnp.float32)
    if Lp != L:
        # TODO(synk): move this pad (and the final slice) in-kernel to avoid
        # one extra HBM pass for lengths that are not multiples of 128.
        xp = jnp.pad(xp, ((0, 0), (0, 0), (0, Lp - L)))

    def conv_w(w):   # (Cout, Cin, K) -> (K, Cout, Cin), bf16 MXU operands
        return jnp.transpose(w, (2, 0, 1)).astype(_MATMUL_DTYPE)

    col = lambda v: v.reshape(C, 1).astype(jnp.float32)

    w1, w2 = conv_w(params["w1"]), conv_w(params["w2"])
    b1, b2 = col(params["b1"]), col(params["b2"])
    g1, g2 = col(params["gamma1"]), col(params["gamma2"])
    be1, be2 = col(params["beta1"]), col(params["beta2"])

    # Single-block design (training BatchNorm needs the whole batch at once):
    # guard the VMEM working set against the per-generation capacity.
    cap = _vmem_capacity_bytes()
    f32 = 4
    workset = 10 * C * Ltot * f32 + 2 * K * C * C * f32   # in/out + live values
    budget = min(int(0.8 * cap), cap - (24 << 20))        # ~40 MiB v7x, ~100 MiB v5e/v6e
    if workset > budget:
        # TODO(synk): lane-tiled grid with two-pass BN (accumulate per-channel
        # sum/sumsq across >=512-lane tiles, then a normalize/apply pass) and a
        # "parallel" axis so v7x's second TensorCore is used.
        raise ValueError(
            f"ResidualCNN single-block working set (~{workset} bytes) exceeds "
            f"the VMEM budget ({budget} bytes on this TPU generation); needs "
            "the tiled two-pass-BN variant.")
    vmem_limit = int(min(max(2 * workset + (4 << 20), 32 << 20),
                         cap - (16 << 20), 100 << 20))

    vmem = pl.BlockSpec(memory_space=pltpu.MemorySpace.VMEM)
    out = pl.pallas_call(
        functools.partial(residual_cnn_kernel, kernel_size=K, length=L,
                          padded_length=Lp, valid_count=N * L),
        out_shape=jax.ShapeDtypeStruct((N, C, Lp), x.dtype),
        in_specs=[vmem] * 9,
        out_specs=vmem,
        scratch_shapes=[pltpu.VMEM((C, Ltot), jnp.float32)],
        compiler_params=pltpu.CompilerParams(vmem_limit_bytes=vmem_limit),
    )(xp, w1, b1, g1, be1, w2, b2, g2, be2)

    return out[:, :, :L] if Lp != L else out


def residual_cnn_reference(x, params, kernel_size, matmul_dtype=jnp.float32):
    """Pure-JAX reference matching PyTorch training-mode semantics.

    matmul_dtype=bfloat16 reproduces the kernel's MXU operand rounding (conv
    inputs/weights rounded to bf16, accumulation in f32) for a tight check.
    """
    P = kernel_size // 2

    def q(a):
        return a.astype(matmul_dtype).astype(jnp.float32)

    def conv(h, w, b):
        y = jax.lax.conv_general_dilated(
            q(h), q(w), window_strides=(1,), padding=[(P, P)],
            dimension_numbers=("NCH", "OIH", "NCH"))
        return y + b[None, :, None]

    def bn(h, g, be, eps=_BN_EPS):
        mean = jnp.mean(h, axis=(0, 2), keepdims=True)
        var = jnp.mean((h - mean) ** 2, axis=(0, 2), keepdims=True)
        return (h - mean) / jnp.sqrt(var + eps) * g[None, :, None] + be[None, :, None]

    res = x
    h = bn(jnp.maximum(conv(x, params["w1"], params["b1"]), 0.0),
           params["gamma1"], params["beta1"])
    h = bn(jnp.maximum(conv(h, params["w2"], params["b2"]), 0.0),
           params["gamma2"], params["beta2"])
    return h + res


if __name__ == "__main__":
    # Primary lane-aligned shape + a shape exercising the pad-to-128 path and
    # a larger odd kernel.
    configs = [(2, 8, 128, 3), (2, 8, 100, 5)]

    for (N, C, L, K) in configs:
        key = jax.random.PRNGKey(0)
        kx, kw1, kb1, kw2, kb2, kg1, kbe1, kg2, kbe2 = jax.random.split(key, 9)

        bound = (C * K) ** -0.5
        params = {
            "w1": jax.random.uniform(kw1, (C, C, K), jnp.float32, -bound, bound),
            "b1": jax.random.uniform(kb1, (C,), jnp.float32, -bound, bound),
            "w2": jax.random.uniform(kw2, (C, C, K), jnp.float32, -bound, bound),
            "b2": jax.random.uniform(kb2, (C,), jnp.float32, -bound, bound),
            "gamma1": jax.random.uniform(kg1, (C,), jnp.float32, 0.5, 1.5),
            "beta1": jax.random.uniform(kbe1, (C,), jnp.float32, -0.5, 0.5),
            "gamma2": jax.random.uniform(kg2, (C,), jnp.float32, 0.5, 1.5),
            "beta2": jax.random.uniform(kbe2, (C,), jnp.float32, -0.5, 0.5),
        }
        x = jax.random.normal(kx, (N, C, L), jnp.float32)

        out = jax.block_until_ready(residual_cnn(x, params, K))
        assert out.shape == (N, C, L)

        # Tight check vs. a reference with identical MXU operand rounding.
        ref_q = residual_cnn_reference(x, params, K, matmul_dtype=_MATMUL_DTYPE)
        err_q = float(jnp.max(jnp.abs(out - ref_q)))
        assert err_q < 1e-2, f"mismatch vs. bf16-feed reference {(N, C, L, K)}: {err_q}"

        # Sanity bound vs. the full-f32 module reference; the gap is bf16
        # MXU-operand rounding through two conv+BN layers (bug-scale errors
        # would be O(1)).
        ref = residual_cnn_reference(x, params, K)
        err = float(jnp.max(jnp.abs(out - ref)))
        assert err < 1e-1, f"mismatch vs. f32 reference {(N, C, L, K)}: {err}"

    print("KERNEL_OK")
</pallas_src>

<mosaic_0001>
module attributes {stable_mosaic.version = 11 : i64} {
  func.func @residual_cnn_kernel(%arg0: memref<2x8x128xf32, #tpu.memory_space<vmem>>, %arg1: memref<3x8x8xbf16, #tpu.memory_space<vmem>>, %arg2: memref<8x1xf32, #tpu.memory_space<vmem>>, %arg3: memref<8x1xf32, #tpu.memory_space<vmem>>, %arg4: memref<8x1xf32, #tpu.memory_space<vmem>>, %arg5: memref<3x8x8xbf16, #tpu.memory_space<vmem>>, %arg6: memref<8x1xf32, #tpu.memory_space<vmem>>, %arg7: memref<8x1xf32, #tpu.memory_space<vmem>>, %arg8: memref<8x1xf32, #tpu.memory_space<vmem>>, %arg9: memref<2x8x128xf32, #tpu.memory_space<vmem>>, %arg10: memref<8x256xf32, #tpu.memory_space<vmem>>) attributes {dimension_semantics = [], scalar_prefetch = 0 : i64, scratch_operands = 1 : i64, tpu.core_type = #tpu.core_type<tc>} {
    %c0 = arith.constant 0 : index
    %c0_0 = arith.constant 0 : index
    %c0_1 = arith.constant 0 : index
    %0 = vector.load %arg0[%c0, %c0_0, %c0_1] : memref<2x8x128xf32, #tpu.memory_space<vmem>>, vector<1x8x128xf32>
    %1 = vector.shape_cast %0 : vector<1x8x128xf32> to vector<8x128xf32>
    %c0_2 = arith.constant 0 : index
    %c0_3 = arith.constant 0 : index
    %2 = vector.load %arg10[%c0_2, %c0_3] : memref<8x256xf32, #tpu.memory_space<vmem>>, vector<8x128xf32>
    tpu.vector_store %arg10[%c0_2, %c0_3], %1 {strides = array<i32>} : memref<8x256xf32, #tpu.memory_space<vmem>>, vector<8x128xf32>,
    %c1 = arith.constant 1 : index
    %c0_4 = arith.constant 0 : index
    %c0_5 = arith.constant 0 : index
    %3 = vector.load %arg0[%c1, %c0_4, %c0_5] : memref<2x8x128xf32, #tpu.memory_space<vmem>>, vector<1x8x128xf32>
    %4 = vector.shape_cast %3 : vector<1x8x128xf32> to vector<8x128xf32>
    %c0_6 = arith.constant 0 : index
    %c128 = arith.constant 128 : index
    %5 = vector.load %arg10[%c0_6, %c128] : memref<8x256xf32, #tpu.memory_space<vmem>>, vector<8x128xf32>
    tpu.vector_store %arg10[%c0_6, %c128], %4 {strides = array<i32>} : memref<8x256xf32, #tpu.memory_space<vmem>>, vector<8x128xf32>,
    %c0_7 = arith.constant 0 : index
    %c0_8 = arith.constant 0 : index
    %6 = vector.load %arg10[%c0_7, %c0_8] : memref<8x256xf32, #tpu.memory_space<vmem>>, vector<8x256xf32>
    %7 = tpu.iota {dimensions = array<i32: 1>} : vector<1x256xi32>
    %c128_i32 = arith.constant 128 : i32
    %c0_i32 = arith.constant 0 : i32
    %8 = arith.cmpi eq, %c128_i32, %c0_i32 : i32
    %c1_i32 = arith.constant 1 : i32
    %9 = arith.select %8, %c1_i32, %c128_i32 : i32
    %10 = vector.broadcast %9 : i32 to vector<1x256xi32>
    %11 = arith.remsi %7, %10 : vector<1x256xi32>
    %c0_i32_9 = arith.constant 0 : i32
    %12 = vector.broadcast %c0_i32_9 : i32 to vector<1x256xi32>
    %13 = arith.cmpi ne, %11, %12 : vector<1x256xi32>
    %c0_i32_10 = arith.constant 0 : i32
    %14 = vector.broadcast %c0_i32_10 : i32 to vector<1x256xi32>
    %15 = arith.cmpi slt, %11, %14 : vector<1x256xi32>
    %c0_i32_11 = arith.constant 0 : i32
    %16 = arith.cmpi slt, %9, %c0_i32_11 : i32
    %17 = vector.broadcast %16 : i1 to vector<1x256xi1>
    %18 = vector.broadcast %17 : vector<1x256xi1> to vector<1x256xi1>
    %19 = arith.xori %15, %18 : vector<1x256xi1>
    %20 = arith.andi %19, %13 : vector<1x256xi1>
    %21 = vector.broadcast %9 : i32 to vector<1x256xi32>
    %22 = arith.addi %11, %21 : vector<1x256xi32>
    %23 = arith.select %20, %22, %11 : vector<1x256xi1>, vector<1x256xi32>
    %c1_i32_12 = arith.constant 1 : i32
    %24 = vector.broadcast %c1_i32_12 : i32 to vector<1x256xi32>
    %25 = arith.cmpi sge, %23, %24 : vector<1x256xi32>
    %c129_i32 = arith.constant 129 : i32
    %26 = vector.broadcast %c129_i32 : i32 to vector<1x256xi32>
    %27 = arith.cmpi slt, %23, %26 : vector<1x256xi32>
    %28 = arith.andi %25, %27 : vector<1x256xi1>
    %c-1_i32 = arith.constant -1 : i32
    %29 = vector.broadcast %c-1_i32 : i32 to vector<1x256xi32>
    %30 = arith.cmpi sge, %23, %29 : vector<1x256xi32>
    %c127_i32 = arith.constant 127 : i32
    %31 = vector.broadcast %c127_i32 : i32 to vector<1x256xi32>
    %32 = arith.cmpi slt, %23, %31 : vector<1x256xi32>
    %33 = arith.andi %30, %32 : vector<1x256xi1>
    %c0_13 = arith.constant 0 : index
    %c0_14 = arith.constant 0 : index
    %c0_15 = arith.constant 0 : index
    %34 = vector.load %arg1[%c0_13, %c0_14, %c0_15] : memref<3x8x8xbf16, #tpu.memory_space<vmem>>, vector<3x8x8xbf16>
    %c0_16 = arith.constant 0 : index
    %c0_17 = arith.constant 0 : index
    %35 = vector.load %arg2[%c0_16, %c0_17] : memref<8x1xf32, #tpu.memory_space<vmem>>, vector<8x1xf32>
    %c0_18 = arith.constant 0 : index
    %c0_19 = arith.constant 0 : index
    %36 = vector.load %arg3[%c0_18, %c0_19] : memref<8x1xf32, #tpu.memory_space<vmem>>, vector<8x1xf32>
    %c0_20 = arith.constant 0 : index
    %c0_21 = arith.constant 0 : index
    %37 = vector.load %arg4[%c0_20, %c0_21] : memref<8x1xf32, #tpu.memory_space<vmem>>, vector<8x1xf32>
    %c1_i32_22 = arith.constant 1 : i32
    %38 = tpu.dynamic_rotate %6 by %c1_i32_22 dim 1 : vector<8x256xf32>, i32 -> vector<8x256xf32>
    %cst = arith.constant 0.000000e+00 : f32
    %39 = vector.shape_cast %28 : vector<1x256xi1> to vector<1x256xi1>
    %40 = vector.broadcast %39 : vector<1x256xi1> to vector<8x256xi1>
    %41 = vector.broadcast %cst : f32 to vector<8x256xf32>
    %42 = arith.select %40, %38, %41 : vector<8x256xi1>, vector<8x256xf32>
    %43 = vector.extract_strided_slice %34 {offsets = [0, 0, 0], sizes = [1, 8, 8], strides = [1, 1, 1]} : vector<3x8x8xbf16> to vector<1x8x8xbf16>
    %44 = vector.shape_cast %43 : vector<1x8x8xbf16> to vector<8x8xbf16>
    %45 = arith.truncf %42 : vector<8x256xf32> to vector<8x256xbf16>
    %cst_23 = arith.constant dense<0.000000e+00> : vector<8x256xf32>
    %46 = tpu.matmul %44, %45, %cst_23 {dimension_numbers = #tpu.dot_dimension_numbers<[1], [0], [0], [1], [0, 0, 1, 1], [], []>} : vector<8x8xbf16>, vector<8x256xbf16>, vector<8x256xf32> -> vector<8x256xf32>
    %47 = vector.extract_strided_slice %34 {offsets = [1, 0, 0], sizes = [1, 8, 8], strides = [1, 1, 1]} : vector<3x8x8xbf16> to vector<1x8x8xbf16>
    %48 = vector.shape_cast %47 : vector<1x8x8xbf16> to vector<8x8xbf16>
    %49 = arith.truncf %6 : vector<8x256xf32> to vector<8x256xbf16>
    %cst_24 = arith.constant dense<0.000000e+00> : vector<8x256xf32>
    %50 = tpu.matmul %48, %49, %cst_24 {dimension_numbers = #tpu.dot_dimension_numbers<[1], [0], [0], [1], [0, 0, 1, 1], [], []>} : vector<8x8xbf16>, vector<8x256xbf16>, vector<8x256xf32> -> vector<8x256xf32>
    %51 = arith.addf %46, %50 : vector<8x256xf32>
    %c255_i32 = arith.constant 255 : i32
    %52 = tpu.dynamic_rotate %6 by %c255_i32 dim 1 : vector<8x256xf32>, i32 -> vector<8x256xf32>
    %cst_25 = arith.constant 0.000000e+00 : f32
    %53 = vector.shape_cast %33 : vector<1x256xi1> to vector<1x256xi1>
    %54 = vector.broadcast %53 : vector<1x256xi1> to vector<8x256xi1>
    %55 = vector.broadcast %cst_25 : f32 to vector<8x256xf32>
    %56 = arith.select %54, %52, %55 : vector<8x256xi1>, vector<8x256xf32>
    %57 = vector.extract_strided_slice %34 {offsets = [2, 0, 0], sizes = [1, 8, 8], strides = [1, 1, 1]} : vector<3x8x8xbf16> to vector<1x8x8xbf16>
    %58 = vector.shape_cast %57 : vector<1x8x8xbf16> to vector<8x8xbf16>
    %59 = arith.truncf %56 : vector<8x256xf32> to vector<8x256xbf16>
    %cst_26 = arith.constant dense<0.000000e+00> : vector<8x256xf32>
    %60 = tpu.matmul %58, %59, %cst_26 {dimension_numbers = #tpu.dot_dimension_numbers<[1], [0], [0], [1], [0, 0, 1, 1], [], []>} : vector<8x8xbf16>, vector<8x256xbf16>, vector<8x256xf32> -> vector<8x256xf32>
    %61 = arith.addf %51, %60 : vector<8x256xf32>
    %62 = vector.broadcast %35 : vector<8x1xf32> to vector<8x256xf32>
    %63 = arith.addf %61, %62 : vector<8x256xf32>
    %cst_27 = arith.constant 0.000000e+00 : f32
    %64 = vector.broadcast %cst_27 : f32 to vector<8x256xf32>
    %65 = arith.maximumf %63, %64 : vector<8x256xf32>
    %cst_28 = arith.constant dense<0.000000e+00> : vector<8xf32>
    %66 = vector.multi_reduction <add>, %65, %cst_28 [1] : vector<8x256xf32> to vector<8xf32>
    %67 = vector.shape_cast %66 : vector<8xf32> to vector<8x1xf32>
    %cst_29 = arith.constant 3.906250e-03 : f32
    %68 = vector.broadcast %cst_29 : f32 to vector<8x1xf32>
    %69 = arith.mulf %67, %68 : vector<8x1xf32>
    %70 = vector.broadcast %69 : vector<8x1xf32> to vector<8x256xf32>
    %71 = arith.subf %65, %70 : vector<8x256xf32>
    %72 = arith.mulf %71, %71 : vector<8x256xf32>
    %cst_30 = arith.constant dense<0.000000e+00> : vector<8xf32>
    %73 = vector.multi_reduction <add>, %72, %cst_30 [1] : vector<8x256xf32> to vector<8xf32>
    %74 = vector.shape_cast %73 : vector<8xf32> to vector<8x1xf32>
    %cst_31 = arith.constant 3.906250e-03 : f32
    %75 = vector.broadcast %cst_31 : f32 to vector<8x1xf32>
    %76 = arith.mulf %74, %75 : vector<8x1xf32>
    %cst_32 = arith.constant 9.99999974E-6 : f32
    %77 = vector.broadcast %cst_32 : f32 to vector<8x1xf32>
    %78 = arith.addf %76, %77 : vector<8x1xf32>
    %79 = math.rsqrt %78 : vector<8x1xf32>
    %80 = arith.mulf %36, %79 : vector<8x1xf32>
    %81 = vector.broadcast %80 : vector<8x1xf32> to vector<8x256xf32>
    %82 = arith.mulf %71, %81 : vector<8x256xf32>
    %83 = vector.broadcast %37 : vector<8x1xf32> to vector<8x256xf32>
    %84 = arith.addf %82, %83 : vector<8x256xf32>
    %c0_33 = arith.constant 0 : index
    %c0_34 = arith.constant 0 : index
    %c0_35 = arith.constant 0 : index
    %85 = vector.load %arg5[%c0_33, %c0_34, %c0_35] : memref<3x8x8xbf16, #tpu.memory_space<vmem>>, vector<3x8x8xbf16>
    %c0_36 = arith.constant 0 : index
    %c0_37 = arith.constant 0 : index
    %86 = vector.load %arg6[%c0_36, %c0_37] : memref<8x1xf32, #tpu.memory_space<vmem>>, vector<8x1xf32>
    %c0_38 = arith.constant 0 : index
    %c0_39 = arith.constant 0 : index
    %87 = vector.load %arg7[%c0_38, %c0_39] : memref<8x1xf32, #tpu.memory_space<vmem>>, vector<8x1xf32>
    %c0_40 = arith.constant 0 : index
    %c0_41 = arith.constant 0 : index
    %88 = vector.load %arg8[%c0_40, %c0_41] : memref<8x1xf32, #tpu.memory_space<vmem>>, vector<8x1xf32>
    %c1_i32_42 = arith.constant 1 : i32
    %89 = tpu.dynamic_rotate %84 by %c1_i32_42 dim 1 : vector<8x256xf32>, i32 -> vector<8x256xf32>
    %cst_43 = arith.constant 0.000000e+00 : f32
    %90 = vector.shape_cast %28 : vector<1x256xi1> to vector<1x256xi1>
    %91 = vector.broadcast %90 : vector<1x256xi1> to vector<8x256xi1>
    %92 = vector.broadcast %cst_43 : f32 to vector<8x256xf32>
    %93 = arith.select %91, %89, %92 : vector<8x256xi1>, vector<8x256xf32>
    %94 = vector.extract_strided_slice %85 {offsets = [0, 0, 0], sizes = [1, 8, 8], strides = [1, 1, 1]} : vector<3x8x8xbf16> to vector<1x8x8xbf16>
    %95 = vector.shape_cast %94 : vector<1x8x8xbf16> to vector<8x8xbf16>
    %96 = arith.truncf %93 : vector<8x256xf32> to vector<8x256xbf16>
    %cst_44 = arith.constant dense<0.000000e+00> : vector<8x256xf32>
    %97 = tpu.matmul %95, %96, %cst_44 {dimension_numbers = #tpu.dot_dimension_numbers<[1], [0], [0], [1], [0, 0, 1, 1], [], []>} : vector<8x8xbf16>, vector<8x256xbf16>, vector<8x256xf32> -> vector<8x256xf32>
    %98 = vector.extract_strided_slice %85 {offsets = [1, 0, 0], sizes = [1, 8, 8], strides = [1, 1, 1]} : vector<3x8x8xbf16> to vector<1x8x8xbf16>
    %99 = vector.shape_cast %98 : vector<1x8x8xbf16> to vector<8x8xbf16>
    %100 = arith.truncf %84 : vector<8x256xf32> to vector<8x256xbf16>
    %cst_45 = arith.constant dense<0.000000e+00> : vector<8x256xf32>
    %101 = tpu.matmul %99, %100, %cst_45 {dimension_numbers = #tpu.dot_dimension_numbers<[1], [0], [0], [1], [0, 0, 1, 1], [], []>} : vector<8x8xbf16>, vector<8x256xbf16>, vector<8x256xf32> -> vector<8x256xf32>
    %102 = arith.addf %97, %101 : vector<8x256xf32>
    %c255_i32_46 = arith.constant 255 : i32
    %103 = tpu.dynamic_rotate %84 by %c255_i32_46 dim 1 : vector<8x256xf32>, i32 -> vector<8x256xf32>
    %cst_47 = arith.constant 0.000000e+00 : f32
    %104 = vector.shape_cast %33 : vector<1x256xi1> to vector<1x256xi1>
    %105 = vector.broadcast %104 : vector<1x256xi1> to vector<8x256xi1>
    %106 = vector.broadcast %cst_47 : f32 to vector<8x256xf32>
    %107 = arith.select %105, %103, %106 : vector<8x256xi1>, vector<8x256xf32>
    %108 = vector.extract_strided_slice %85 {offsets = [2, 0, 0], sizes = [1, 8, 8], strides = [1, 1, 1]} : vector<3x8x8xbf16> to vector<1x8x8xbf16>
    %109 = vector.shape_cast %108 : vector<1x8x8xbf16> to vector<8x8xbf16>
    %110 = arith.truncf %107 : vector<8x256xf32> to vector<8x256xbf16>
    %cst_48 = arith.constant dense<0.000000e+00> : vector<8x256xf32>
    %111 = tpu.matmul %109, %110, %cst_48 {dimension_numbers = #tpu.dot_dimension_numbers<[1], [0], [0], [1], [0, 0, 1, 1], [], []>} : vector<8x8xbf16>, vector<8x256xbf16>, vector<8x256xf32> -> vector<8x256xf32>
    %112 = arith.addf %102, %111 : vector<8x256xf32>
    %113 = vector.broadcast %86 : vector<8x1xf32> to vector<8x256xf32>
    %114 = arith.addf %112, %113 : vector<8x256xf32>
    %cst_49 = arith.constant 0.000000e+00 : f32
    %115 = vector.broadcast %cst_49 : f32 to vector<8x256xf32>
    %116 = arith.maximumf %114, %115 : vector<8x256xf32>
    %cst_50 = arith.constant dense<0.000000e+00> : vector<8xf32>
    %117 = vector.multi_reduction <add>, %116, %cst_50 [1] : vector<8x256xf32> to vector<8xf32>
    %118 = vector.shape_cast %117 : vector<8xf32> to vector<8x1xf32>
    %cst_51 = arith.constant 3.906250e-03 : f32
    %119 = vector.broadcast %cst_51 : f32 to vector<8x1xf32>
    %120 = arith.mulf %118, %119 : vector<8x1xf32>
    %121 = vector.broadcast %120 : vector<8x1xf32> to vector<8x256xf32>
    %122 = arith.subf %116, %121 : vector<8x256xf32>
    %123 = arith.mulf %122, %122 : vector<8x256xf32>
    %cst_52 = arith.constant dense<0.000000e+00> : vector<8xf32>
    %124 = vector.multi_reduction <add>, %123, %cst_52 [1] : vector<8x256xf32> to vector<8xf32>
    %125 = vector.shape_cast %124 : vector<8xf32> to vector<8x1xf32>
    %cst_53 = arith.constant 3.906250e-03 : f32
    %126 = vector.broadcast %cst_53 : f32 to vector<8x1xf32>
    %127 = arith.mulf %125, %126 : vector<8x1xf32>
    %cst_54 = arith.constant 9.99999974E-6 : f32
    %128 = vector.broadcast %cst_54 : f32 to vector<8x1xf32>
    %129 = arith.addf %127, %128 : vector<8x1xf32>
    %130 = math.rsqrt %129 : vector<8x1xf32>
    %131 = arith.mulf %87, %130 : vector<8x1xf32>
    %132 = vector.broadcast %131 : vector<8x1xf32> to vector<8x256xf32>
    %133 = arith.mulf %122, %132 : vector<8x256xf32>
    %134 = vector.broadcast %88 : vector<8x1xf32> to vector<8x256xf32>
    %135 = arith.addf %133, %134 : vector<8x256xf32>
    %136 = arith.addf %135, %6 : vector<8x256xf32>
    %137 = vector.extract_strided_slice %136 {offsets = [0, 0], sizes = [8, 128], strides = [1, 1]} : vector<8x256xf32> to vector<8x128xf32>
    %c0_55 = arith.constant 0 : index
    %c0_56 = arith.constant 0 : index
    %c0_57 = arith.constant 0 : index
    %138 = vector.load %arg9[%c0_55, %c0_56, %c0_57] : memref<2x8x128xf32, #tpu.memory_space<vmem>>, vector<1x8x128xf32>
    %139 = vector.shape_cast %138 : vector<1x8x128xf32> to vector<8x128xf32>
    %140 = vector.shape_cast %137 : vector<8x128xf32> to vector<1x8x128xf32>
    tpu.vector_store %arg9[%c0_55, %c0_56, %c0_57], %140 {strides = array<i32>} : memref<2x8x128xf32, #tpu.memory_space<vmem>>, vector<1x8x128xf32>,
    %141 = vector.extract_strided_slice %136 {offsets = [0, 128], sizes = [8, 128], strides = [1, 1]} : vector<8x256xf32> to vector<8x128xf32>
    %c1_58 = arith.constant 1 : index
    %c0_59 = arith.constant 0 : index
    %c0_60 = arith.constant 0 : index
    %142 = vector.load %arg9[%c1_58, %c0_59, %c0_60] : memref<2x8x128xf32, #tpu.memory_space<vmem>>, vector<1x8x128xf32>
    %143 = vector.shape_cast %142 : vector<1x8x128xf32> to vector<8x128xf32>
    %144 = vector.shape_cast %141 : vector<8x128xf32> to vector<1x8x128xf32>
    tpu.vector_store %arg9[%c1_58, %c0_59, %c0_60], %144 {strides = array<i32>} : memref<2x8x128xf32, #tpu.memory_space<vmem>>, vector<1x8x128xf32>,
    return
  }
}

</mosaic_0001>

<bundles_post_ra>
// kernel: tpu_custom_call.1
= control target key start
LH: loop header
LB: loop body
LE: loop exit
PB: predicated region body
PF: predicated region fallthrough
CT: control target
= control target key end

     0   :  { %vm107_vm0 = vcmask 1043456   ;;  %v618_v5 = vmov 0   ;;  %s816_s0 = inlined_call_operand.vmem [shape: f32[2,8,128], index: 0, kind: input, shape index: {}]   ;;  %s817_s1 = inlined_call_operand.vmem [shape: bf16[3,8,8], index: 1, kind: input, shape index: {}]   ;;  %s818_s2 = inlined_call_operand.vmem [shape: f32[8,1], index: 2, kind: input, shape index: {}]   ;;  %s819_s3 = inlined_call_operand.vmem [shape: f32[8,1], index: 3, kind: input, shape index: {}]   ;;  %s820_s4 = inlined_call_operand.vmem [shape: f32[8,1], index: 4, kind: input, shape index: {}]   ;;  %s821_s5 = inlined_call_operand.vmem [shape: bf16[3,8,8], index: 5, kind: input, shape index: {}]   ;;  %s822_s6 = inlined_call_operand.vmem [shape: f32[8,1], index: 6, kind: input, shape index: {}]   ;;  %s823_s7 = inlined_call_operand.vmem [shape: f32[8,1], index: 7, kind: input, shape index: {}]   ;;  %s824_s8 = inlined_call_operand.vmem [shape: f32[8,1], index: 8, kind: input, shape index: {}]   ;;  %s825_s9 = inlined_call_operand.hbm [shape: f32[2,8,128], index: 9, kind: output, shape index: {}]  }
   0x1   :  { %v677_v0 = vld [vmem:[%s816_s0] sm:$0xff]  ;;  %v682_v1 = vld [vmem:[%s816_s0 + $0x8] sm:$0xff]  ;;  %146 = vmatprep.mubr.bf16.mxu0 %v618_v5  ;;  %196 = vmatprep.mubr.bf16.mxu1 %v618_v5 }
   0x2   :  { %v568_v2 = vpack.i.bf16 %v682_v1, %v677_v0  ;;  %v102_v3 = vpack.c.bf16 %v682_v1, %v682_v1  ;;  %v101_v4 = vpack.c.bf16 %v677_v0, %v677_v0  ;;  %578 = vset.pattern.permute.xlu1 %v618_v5 }
   0x3   :  { %14 = vsyncpa [#allocation4], 0  ;;  %s619_s0 = smov 1   ;;  %v81_v7 = vld [vmem:[%s817_s1 + $0x4] sm:$0xf]  ;;  %vm103_vm1 = vcmask 64512   ;;  %579 = vset.pattern.permute.xlu0 %v618_v5  ;;  %v41_v9 = vlaneseq }
   0x4   :  { %569 = vrot.lane.b32.xlu0 %v568_v2, %s619_s0  ;;  %550 = vmatprep.subr.msk.bf16.mxu0 %vm107_vm0, %v102_v3  ;;  %v109_v6 = vsel %vm107_vm0, %v101_v4, 0  ;;  %v83_v8 = vld [vmem:[%s818_s2] sm:$0xff]  ;;  %s620_s17 = smov 127   ;;  %v82_v36 = vld [vmem:[%s817_s1 + $0x8] sm:$0xf]  ;;  %s621_s11 = smov [#allocation3]  }
   0x5   :  { %115 = vmatpush1.bf16.msra.mxu0 %v109_v6  ;;  %274 = vperm.xlu1 %578, %v83_v8   ;;  %v706_v10 = vand.u32 127, %v41_v9  ;;  %v80_v30 = vld [vmem:[%s817_s1] sm:$0xf]  ;;  %v312_v20 = vld [vmem:[%s821_s5 + $0x8] sm:$0xf]  ;;  %s538_s12 = sshll.u32 %s621_s11, 4  ;;  %s539_s12 = int_to_ptr.vmem [resolvable:$true] %s538_s12 }
   0x6   :  { %v85_v59 = vld [vmem:[%s820_s4] sm:$0xff]  ;;  %p599_p1 = scmp.lt.s32.totalorder %s539_s12, %s539_s12 }
   0x7   :  { %v43_v11 = vadd.s32 128, %v706_v10  ;;  %vm90_vm2 = vcmp.lt.s32.totalorder %v706_v10, 1  ;;  %vm68_vm4 = vcmp.ge.s32.totalorder %v706_v10, 1  ;;  %vm76_vm5 = vcmp.lt.s32.totalorder %v706_v10, 127  ;;  %v84_v9 = vld [vmem:[%s819_s3] sm:$0xff] }
   0x8   :  { %574 = vrot.lane.b32.xlu0 %v568_v2, %s620_s17  ;;  %551 = vmatmul.mubr.msk.bf16.vlgmr.msra.gmra.mrb[0].mxu0 %vm103_vm1, %v81_v7 }
   0x9   :  { %261 = vmatprep.mubr.bf16.mxu0 %v618_v5  ;;  %v55_v12 = vand.u32 127, %v43_v11 }
   0xb   :  { %vm710_vm3 = vcmp.ge.s32.totalorder %v55_v12, 1  ;;  %vm720_vm6 = vcmp.lt.s32.totalorder %v55_v12, 127 }
  0x76   :  { %v570_v13 = vpop.permute.xlu0 %569 }
  0x77   :  { %v572_v14 = vunpack.i.h.bf16 %v570_v13  ;;  %v571_v15 = vunpack.i.l.bf16 %v570_v13 }
  0x79   :  { %v91_v17 = vsel %vm90_vm2, %v571_v15, %v572_v14  ;;  %v92_v18 = vsel %vm90_vm2, %v572_v14, %v571_v15 }
  0x7a   :  { %v575_v19 = vpop.permute.xlu0 %574  ;;  %v98_v21 = vsel %vm710_vm3, %v91_v17, 0.0  ;;  %v97_v22 = vsel %vm68_vm4, %v92_v18, 0.0 }
  0x7b   :  { %v577_v23 = vunpack.i.h.bf16 %v575_v19  ;;  %v576_v24 = vunpack.i.l.bf16 %v575_v19  ;;  %v100_v25 = vpack.c.bf16 %v98_v21, %v98_v21  ;;  %v99_v26 = vpack.c.bf16 %v97_v22, %v97_v22 }
  0x7d   :  { %v210_v27 = vsel %vm76_vm5, %v576_v24, %v577_v23  ;;  %v211_v28 = vsel %vm76_vm5, %v577_v23, %v576_v24  ;;  %552 = vmatprep.subr.msk.bf16.mxu1 %vm107_vm0, %v100_v25  ;;  %v159_v29 = vsel %vm107_vm0, %v99_v26, 0  ;;  %v311_v25 = vld [vmem:[%s821_s5 + $0x4] sm:$0xf] }
  0x7e   :  { %165 = vmatpush1.bf16.msra.mxu1 %v159_v29  ;;  %v217_v31 = vsel %vm720_vm6, %v211_v28, 0.0  ;;  %v216_v32 = vsel %vm76_vm5, %v210_v27, 0.0  ;;  %v313_v26 = vld [vmem:[%s822_s6] sm:$0xff] }
  0x7f   :  { %v219_v33 = vpack.c.bf16 %v217_v31, %v217_v31  ;;  %v218_v34 = vpack.c.bf16 %v216_v32, %v216_v32 }
  0x81   :  { %553 = vmatmul.mubr.msk.bf16.vlgmr.msra.gmra.mrb[0].mxu1 %vm103_vm1, %v80_v30  ;;  %554 = vmatprep.subr.msk.bf16.mxu0 %vm107_vm0, %v219_v33  ;;  %v224_v35 = vsel %vm107_vm0, %v218_v34, 0 }
  0x82   :  { %230 = vmatpush1.bf16.msra.mxu0 %v224_v35  ;;  %369 = vmatprep.mubr.bf16.mxu1 %v618_v5 }
  0x84   :  { %v275_v48 = vpop.permute.xlu1 %274 }
  0x85   :  { %555 = vmatmul.mubr.msk.bf16.vlgmr.msra.gmra.mrb[4].mxu0 %vm103_vm1, %v82_v36 }
  0x86   :  { %419 = vmatprep.mubr.bf16.mxu0 %v618_v5 }
  0xdb   :  { %v148_v37 = vpop.f32.mrb[0].mxu0 }
  0xdc   :  { %v150_v38 = vpop.f32.mrb[1].mxu0 }
  0xdd   :  { %v152_v39 = vpop.f32.mrb[2].mxu0 }
  0xde   :  { %v153_v40 = vpop.f32.mrb[3].mxu0 }
 0x154   :  { %v198_v41 = vpop.f32.mrb[0].mxu1 }
 0x155   :  { %v199_v42 = vadd.f32 %v198_v41, %v148_v37  ;;  %v200_v43 = vpop.f32.mrb[1].mxu1  ;;  %v310_v41 = vld [vmem:[%s821_s5] sm:$0xf] }
 0x156   :  { %v201_v44 = vadd.f32 %v200_v43, %v150_v38  ;;  %v202_v45 = vpop.f32.mrb[2].mxu1 }
 0x157   :  { %v203_v46 = vpop.f32.mrb[3].mxu1 }
 0x158   :  { %v263_v47 = vpop.f32.mrb[4].mxu0 }
 0x159   :  { %v270_v49 = vadd.f32 %v263_v47, %v199_v42  ;;  %v265_v50 = vpop.f32.mrb[5].mxu0 }
 0x15a   :  { %v271_v51 = vadd.f32 %v265_v50, %v201_v44  ;;  %v267_v52 = vpop.f32.mrb[6].mxu0 }
 0x15b   :  { %v277_v53 = vadd.f32 %v275_v48, %v270_v49  ;;  %v268_v54 = vpop.f32.mrb[7].mxu0 }
 0x15c   :  { %v278_v55 = vadd.f32 %v275_v48, %v271_v51 }
 0x15d   :  { %v279_v56 = vmax.f32 %v277_v53, 0.0 }
 0x15e   :  { %v280_v57 = vmax.f32 %v278_v55, 0.0 }
 0x160   :  { %v281_v58 = vadd.f32 %v280_v57, %v279_v56 }
 0x162   :  { %282 = vadd.xlane.f32.xlu1 %v281_v58 }
 0x173   :  { %305 = vperm.xlu1 %578, %v85_v59  }
 0x1ef   :  { %v283_v60 = vpop.xlane.xlu1 %282 }
 0x1f0   :  { %v284_v61 = vmul.f32 0.00390625, %v283_v60 }
 0x1f2   :  { %v285_v62 = vsub.f32 %v279_v56, %v284_v61  ;;  %v286_v63 = vsub.f32 %v280_v57, %v284_v61 }
 0x1f3   :  { %v306_v17 = vpop.permute.xlu1 %305 }
 0x1f4   :  { %v287_v2 = vmul.f32 %v285_v62, %v285_v62  ;;  %v288_v3 = vmul.f32 %v286_v63, %v286_v63 }
 0x1f6   :  { %v289_v4 = vadd.f32 %v288_v3, %v287_v2 }
 0x1f8   :  { %290 = vadd.xlane.f32.xlu0 %v289_v4 }
 0x285   :  { %v291_v6 = vpop.xlane.xlu0 %290 }
 0x286   :  { %v292_v7 = vmul.f32 0.00390625, %v291_v6 }
 0x288   :  { %v293_v8 = vadd.f32 1e-05, %v292_v7 }
 0x28a   :  { %590 = vrsqrt.f32 %v293_v8 }
 0x294   :  { %v591_v11 = vpop.eup %590 }
 0x295   :  { %v295_v12 = vmul.f32 %v591_v11, %v84_v9 }
 0x297   :  { %298 = vperm.xlu0 %579, %v295_v12  }
 0x316   :  { %v299_v13 = vpop.permute.xlu0 %298 }
 0x317   :  { %v301_v14 = vmul.f32 %v299_v13, %v285_v62  ;;  %v302_v15 = vmul.f32 %v299_v13, %v286_v63 }
 0x319   :  { %v308_v18 = vadd.f32 %v306_v17, %v301_v14  ;;  %v309_v19 = vadd.f32 %v306_v17, %v302_v15  ;;  %v315_v14 = vld [vmem:[%s824_s8] sm:$0xff]  ;;  %s594_s8 = scalar_lea.vmem %s539_s12, 256 }
 0x31a   :  { %p595_p0 = scmp.ne.s32.totalorder %s539_s12, %s594_s8  ;;  %p600_p2 = scmp.lt.s32.totalorder %s594_s8, %s594_s8 }
 0x31b   :  { %v327_v21 = vpack.c.bf16 %v309_v19, %v309_v19  ;;  %v580_v22 = vpack.i.bf16 %v309_v19, %v308_v18  ;;  %v326_v23 = vpack.c.bf16 %v308_v18, %v308_v18  ;;  %v314_v19 = vld [vmem:[%s823_s7] sm:$0xff] }
 0x31c   :  { %p601_p3 = por %p600_p2, %p599_p1 }
 0x31d   :  { %556 = vmatprep.subr.msk.bf16.mxu1 %vm107_vm0, %v327_v21  ;;  %581 = vrot.lane.b32.xlu1 %v580_v22, %s619_s0  ;;  %v332_v24 = vsel %vm107_vm0, %v326_v23, 0 }
 0x31e   :  { %338 = vmatpush1.bf16.msra.mxu1 %v332_v24  ;;  %p602_p4 = pnand %p601_p3, %p595_p0 }
 0x321   :  { %586 = vrot.lane.b32.xlu1 %v580_v22, %s620_s17  ;;  %557 = vmatmul.mubr.msk.bf16.vlgmr.msra.gmra.mrb[4].mxu1 %vm103_vm1, %v311_v25 }
 0x322   :  { %479 = vmatprep.mubr.bf16.mxu1 %v618_v5 }
 0x325   :  { %492 = vperm.xlu1 %578, %v313_v26  }
 0x38f   :  { %v582_v27 = vpop.permute.xlu1 %581 }
 0x390   :  { %v584_v28 = vunpack.i.h.bf16 %v582_v27  ;;  %v583_v29 = vunpack.i.l.bf16 %v582_v27 }
 0x392   :  { %v320_v30 = vsel %vm90_vm2, %v583_v29, %v584_v28  ;;  %v321_v31 = vsel %vm90_vm2, %v584_v28, %v583_v29 }
 0x393   :  { %v323_v32 = vsel %vm710_vm3, %v320_v30, 0.0  ;;  %v587_v33 = vpop.permute.xlu1 %586  ;;  %v322_v34 = vsel %vm68_vm4, %v321_v31, 0.0 }
 0x394   :  { %v589_v35 = vunpack.i.h.bf16 %v587_v33  ;;  %v588_v36 = vunpack.i.l.bf16 %v587_v33  ;;  %v325_v5 = vpack.c.bf16 %v323_v32, %v323_v32  ;;  %v324_v37 = vpack.c.bf16 %v322_v34, %v322_v34 }
 0x396   :  { %v432_v38 = vsel %vm76_vm5, %v588_v36, %v589_v35  ;;  %v433_v39 = vsel %vm76_vm5, %v589_v35, %v588_v36  ;;  %558 = vmatprep.subr.msk.bf16.mxu0 %vm107_vm0, %v325_v5  ;;  %v382_v40 = vsel %vm107_vm0, %v324_v37, 0 }
 0x397   :  { %v435_v16 = vsel %vm720_vm6, %v433_v39, 0.0  ;;  %388 = vmatpush1.bf16.msra.mxu0 %v382_v40  ;;  %v434_v42 = vsel %vm76_vm5, %v432_v38, 0.0 }
 0x398   :  { %v437_v43 = vpack.c.bf16 %v435_v16, %v435_v16  ;;  %v436_v44 = vpack.c.bf16 %v434_v42, %v434_v42 }
 0x39a   :  { %559 = vmatmul.mubr.msk.bf16.vlgmr.msra.gmra.mrb[8].mxu0 %vm103_vm1, %v310_v41  ;;  %560 = vmatprep.subr.msk.bf16.mxu1 %vm107_vm0, %v437_v43  ;;  %v442_v45 = vsel %vm107_vm0, %v436_v44, 0 }
 0x39b   :  { %448 = vmatpush1.bf16.msra.mxu1 %v442_v45 }
 0x39e   :  { %561 = vmatmul.mubr.msk.bf16.vlgmr.msra.gmra.mrb[8].mxu1 %vm103_vm1, %v312_v20 }
 0x3a4   :  { %v493_v58 = vpop.permute.xlu1 %492 }
 0x3f4   :  { %v371_v46 = vpop.f32.mrb[4].mxu1 }
 0x3f5   :  { %v373_v47 = vpop.f32.mrb[5].mxu1 }
 0x3f6   :  { %v375_v48 = vpop.f32.mrb[6].mxu1 }
 0x3f7   :  { %v376_v10 = vpop.f32.mrb[7].mxu1 }
 0x46d   :  { %v421_v49 = vpop.f32.mrb[8].mxu0 }
 0x46e   :  { %v422_v50 = vadd.f32 %v421_v49, %v371_v46  ;;  %v423_v51 = vpop.f32.mrb[9].mxu0 }
 0x46f   :  { %v424_v52 = vadd.f32 %v423_v51, %v373_v47  ;;  %v425_v53 = vpop.f32.mrb[10].mxu0 }
 0x470   :  { %v426_v54 = vpop.f32.mrb[11].mxu0 }
 0x471   :  { %v481_v55 = vpop.f32.mrb[8].mxu1 }
 0x472   :  { %v488_v56 = vadd.f32 %v481_v55, %v422_v50  ;;  %v483_v57 = vpop.f32.mrb[9].mxu1 }
 0x473   :  { %v489_v59 = vadd.f32 %v483_v57, %v424_v52  ;;  %v485_v60 = vpop.f32.mrb[10].mxu1 }
 0x474   :  { %v495_v61 = vadd.f32 %v493_v58, %v488_v56  ;;  %v486_v62 = vpop.f32.mrb[11].mxu1 }
 0x475   :  { %v496_v63 = vadd.f32 %v493_v58, %v489_v59 }
 0x476   :  { %v497_v2 = vmax.f32 %v495_v61, 0.0 }
 0x477   :  { %v498_v3 = vmax.f32 %v496_v63, 0.0 }
 0x479   :  { %v499_v4 = vadd.f32 %v498_v3, %v497_v2 }
 0x47b   :  { %500 = vadd.xlane.f32.xlu1 %v499_v4 }
 0x508   :  { %v501_v6 = vpop.xlane.xlu1 %500 }
 0x509   :  { %v502_v7 = vmul.f32 0.00390625, %v501_v6 }
 0x50b   :  { %v503_v8 = vsub.f32 %v497_v2, %v502_v7  ;;  %v504_v9 = vsub.f32 %v498_v3, %v502_v7 }
 0x50d   :  { %v505_v11 = vmul.f32 %v503_v8, %v503_v8  ;;  %v506_v12 = vmul.f32 %v504_v9, %v504_v9 }
 0x50f   :  { %v507_v13 = vadd.f32 %v506_v12, %v505_v11 }
 0x511   :  { %508 = vadd.xlane.f32.xlu0 %v507_v13 }
 0x527   :  { %523 = vperm.xlu0 %579, %v315_v14  }
 0x59e   :  { %v509_v15 = vpop.xlane.xlu0 %508 }
 0x59f   :  { %v510_v17 = vmul.f32 0.00390625, %v509_v15 }
 0x5a1   :  { %v511_v18 = vadd.f32 1e-05, %v510_v17 }
 0x5a3   :  { %592 = vrsqrt.f32 %v511_v18 }
 0x5a6   :  { %v524_v26 = vpop.permute.xlu0 %523 }
 0x5ad   :  { %v593_v21 = vpop.eup %592 }
 0x5ae   :  { %v513_v22 = vmul.f32 %v593_v21, %v314_v19 }
 0x5b0   :  { %516 = vperm.xlu1 %578, %v513_v22  }
 0x62f   :  { %v517_v23 = vpop.permute.xlu1 %516 }
 0x630   :  { %v519_v24 = vmul.f32 %v517_v23, %v503_v8  ;;  %v520_v25 = vmul.f32 %v517_v23, %v504_v9 }
 0x632   :  { %v526_v27 = vadd.f32 %v524_v26, %v519_v24  ;;  %v527_v28 = vadd.f32 %v524_v26, %v520_v25 }
 0x634   :  { %v528_v29 = vadd.f32 %v526_v27, %v677_v0  ;;  %v529_v30 = vadd.f32 %v682_v1, %v527_v28 }
 0x636   :  { %530 = vst [vmem:[#allocation3] sm:$0xff] %v528_v29  ;;  %532 = vst [vmem:[#allocation3 + $0x8] sm:$0xff] %v529_v30 }
 0x637   :  { %605 = shalt.err (!%p602_p4)
}
 0x638   :  { %s606_s13 = scalar_lea.hbm %s825_s9, 256 }
 0x639   :  { %p607_p5 = scmp.ne.s32.totalorder %s825_s9, %s606_s13  ;;  %p610_p6 = scmp.lt.u32.totalorder %s606_s13, %s825_s9 }
 0x63b   :  { %p612_p7 = pnand %p610_p6, %p607_p5 }
 0x63d   :  { %615 = shalt.err (!%p612_p7)
}
 0x63e   :  { %s622_s2 = smov 128   ;;  %s623_s18 = smov 8  }
 0x63f   :  { %544 = dma.vmem_to_hbm [thread:$0]  %s539_s12, 256, %s825_s9, [#allocation4], %s622_s2, %s622_s2, %s623_s18  }
 0x640   :  { %616 = dma.done.wait [#allocation4], 256  }
 0x641   :  { %617 = vsyncadd [#allocation4], 4294967040 }
 0x642   :  { %548 = vsyncpa [#allocation4], 1 }

</bundles_post_ra>
